<compile_context>
chip_gen: v7x
topology: tpu7x:2x2x1
jax: 0.10.0
libtpu: 0.0.40
codegen_flags: <defaults>
</compile_context>

<pallas_src>
import functools

import jax
import jax.numpy as jnp
from jax.experimental import pallas as pl
from jax.experimental.pallas import tpu as pltpu

# ---- scaled-down "bert-base" config (shapes small for the demo) ----
VOCAB = 100
H = 32                 # hidden_size
N_LAYERS = 2           # num_hidden_layers
N_HEADS = 2
HEAD_DIM = H // N_HEADS
FFN = 64               # intermediate_size
ADAPTER_DIM = 16       # adapter bottleneck ("adapter_dim")
NUM_CHOICES = 4        # outer loop `for i in range(4)`
BATCH = 2
SEQ = 8
BERT_EPS = 1e-12       # BERT LayerNorm eps
ADAPTER_EPS = 1e-5     # nn.LayerNorm default eps

# ---- tile sizes (demo scale; see scaling notes above for real bert-base) ----
ROW_TILE = 32          # rows per grid step for LN / FFN kernels (multiple of 16 for bf16 slabs)
ATTN_BATCH_TILE = 4    # sequences per grid step for the attention kernel


# ----------------------------------------------------------------------------
# In-kernel helpers (traced inside Pallas kernels, all f32 elementwise math)
# ----------------------------------------------------------------------------
def _layernorm(y, g, b, eps):
    mean = jnp.mean(y, axis=-1, keepdims=True)
    centered = y - mean
    var = jnp.mean(centered * centered, axis=-1, keepdims=True)
    return centered * jax.lax.rsqrt(var + eps) * g + b


def _gelu(x):
    # TODO(synk): HF BERT uses exact erf-GELU; tanh approximation kept (EUP-friendly).
    c = 0.7978845608028654
    return 0.5 * x * (1.0 + jnp.tanh(c * (x + 0.044715 * x * x * x)))


# ----------------------------------------------------------------------------
# Pallas kernels
# ----------------------------------------------------------------------------
def _ln_kernel(x_ref, g_ref, b_ref, o_ref, *, eps):
    x = x_ref[...].astype(jnp.float32)
    o_ref[...] = _layernorm(x, g_ref[...], b_ref[...], eps).astype(o_ref.dtype)


def layernorm_bf16(x, gamma, beta, eps):
    """Row-tiled LayerNorm; emits a bf16 slab (feeds the first attention block)."""
    M, D = x.shape
    tm = ROW_TILE
    assert M % tm == 0
    return pl.pallas_call(
        functools.partial(_ln_kernel, eps=eps),
        grid=(M // tm,),
        in_specs=[
            pl.BlockSpec((tm, D), lambda i: (i, 0)),
            pl.BlockSpec((1, D), lambda i: (0, 0)),
            pl.BlockSpec((1, D), lambda i: (0, 0)),
        ],
        out_specs=pl.BlockSpec((tm, D), lambda i: (i, 0)),
        out_shape=jax.ShapeDtypeStruct((M, D), jnp.bfloat16),
        compiler_params=pltpu.CompilerParams(dimension_semantics=("parallel",)),
    )(x, gamma.reshape(1, D), beta.reshape(1, D))


def _attn_block_kernel(x_ref, wqkv_ref, bqkv_ref, wo_ref, bo_ref, g_ref, b_ref,
                       bias_ref, o_ref, *, n_heads, head_dim, tb, seq, eps):
    """Fused QKV matmul + per-head softmax attention + output projection + residual LN.

    Processes `tb` full sequences per grid step.  Softmax scale is pre-folded into the
    Q columns of wqkv (so no per-score multiply here).
    """
    x_bf = x_ref[...]                                            # (tb*seq, H) bf16
    x = x_bf.astype(jnp.float32)
    hid = n_heads * head_dim

    # Fused QKV projection: one MXU pass, bf16 inputs, f32 accumulation.
    qkv = jnp.dot(x_bf, wqkv_ref[...],
                  preferred_element_type=jnp.float32) + bqkv_ref[...]
    qkv3 = qkv.reshape(tb, seq, 3 * hid)                         # (tb, S, 3H)
    bias = bias_ref[...]                                         # (tb, 1, S) f32, added once/head
    wo = wo_ref[...]                                             # (H, H) bf16, loaded once

    # Per-head attention accumulated straight into the output projection
    # (no lane-axis concatenate of head contexts).
    attn_out = jnp.zeros((tb * seq, hid), jnp.float32)
    for h in range(n_heads):                                     # static unroll (2 heads)
        q = qkv3[:, :, h * head_dim:(h + 1) * head_dim]
        k = qkv3[:, :, hid + h * head_dim:hid + (h + 1) * head_dim]
        v = qkv3[:, :, 2 * hid + h * head_dim:2 * hid + (h + 1) * head_dim]
        s = jnp.einsum("bqd,bkd->bqk",
                       q.astype(jnp.bfloat16), k.astype(jnp.bfloat16),
                       preferred_element_type=jnp.float32) + bias
        m = jnp.max(s, axis=-1, keepdims=True)
        p = jnp.exp(s - m)
        p = p * pl.reciprocal(jnp.sum(p, axis=-1, keepdims=True), approx=True)
        ctx = jnp.einsum("bqk,bkd->bqd",
                         p.astype(jnp.bfloat16), v.astype(jnp.bfloat16),
                         preferred_element_type=jnp.float32)     # (tb, S, head_dim)
        attn_out = attn_out + jnp.dot(
            ctx.reshape(tb * seq, head_dim).astype(jnp.bfloat16),
            wo[h * head_dim:(h + 1) * head_dim, :],
            preferred_element_type=jnp.float32)
    attn_out = attn_out + bo_ref[...]

    o_ref[...] = _layernorm(attn_out + x, g_ref[...], b_ref[...], eps).astype(o_ref.dtype)


def attn_block(x, lp, mask_bias, btot, seq):
    M, D = x.shape
    tb = ATTN_BATCH_TILE
    assert btot % tb == 0
    rows = tb * seq
    return pl.pallas_call(
        functools.partial(_attn_block_kernel, n_heads=N_HEADS, head_dim=HEAD_DIM,
                          tb=tb, seq=seq, eps=BERT_EPS),
        grid=(btot // tb,),
        in_specs=[
            pl.BlockSpec((rows, D), lambda i: (i, 0)),
            pl.BlockSpec((D, 3 * D), lambda i: (0, 0)),
            pl.BlockSpec((1, 3 * D), lambda i: (0, 0)),
            pl.BlockSpec((D, D), lambda i: (0, 0)),
            pl.BlockSpec((1, D), lambda i: (0, 0)),
            pl.BlockSpec((1, D), lambda i: (0, 0)),
            pl.BlockSpec((1, D), lambda i: (0, 0)),
            pl.BlockSpec((tb, 1, seq), lambda i: (i, 0, 0)),
        ],
        out_specs=pl.BlockSpec((rows, D), lambda i: (i, 0)),
        out_shape=jax.ShapeDtypeStruct((M, D), jnp.bfloat16),
        compiler_params=pltpu.CompilerParams(dimension_semantics=("parallel",)),
    )(x, lp["wqkv"], lp["bqkv"].reshape(1, 3 * D), lp["wo"], lp["bo"].reshape(1, D),
      lp["attn_ln_g"].reshape(1, D), lp["attn_ln_b"].reshape(1, D), mask_bias)


def _ffn_kernel(x_ref, w1_ref, b1_ref, w2_ref, b2_ref, g_ref, b_ref, h_ref, *, eps):
    """FFN (W1 + GELU + W2) + residual LayerNorm, emitting the bf16 BERT hidden state."""
    x_bf = x_ref[...]                                            # (tm, H) bf16
    x = x_bf.astype(jnp.float32)
    inter = jnp.dot(x_bf, w1_ref[...],
                    preferred_element_type=jnp.float32) + b1_ref[...]
    inter = _gelu(inter)
    ffn = jnp.dot(inter.astype(jnp.bfloat16), w2_ref[...],
                  preferred_element_type=jnp.float32) + b2_ref[...]
    h_ref[...] = _layernorm(ffn + x, g_ref[...], b_ref[...], eps).astype(h_ref.dtype)


def ffn_block(x, lp):
    M, D = x.shape
    tm = ROW_TILE
    assert M % tm == 0
    return pl.pallas_call(
        functools.partial(_ffn_kernel, eps=BERT_EPS),
        grid=(M // tm,),
        in_specs=[
            pl.BlockSpec((tm, D), lambda i: (i, 0)),
            pl.BlockSpec((D, FFN), lambda i: (0, 0)),
            pl.BlockSpec((1, FFN), lambda i: (0, 0)),
            pl.BlockSpec((FFN, D), lambda i: (0, 0)),
            pl.BlockSpec((1, D), lambda i: (0, 0)),
            pl.BlockSpec((1, D), lambda i: (0, 0)),
            pl.BlockSpec((1, D), lambda i: (0, 0)),
        ],
        out_specs=pl.BlockSpec((tm, D), lambda i: (i, 0)),
        out_shape=jax.ShapeDtypeStruct((M, D), jnp.bfloat16),
        compiler_params=pltpu.CompilerParams(dimension_semantics=("parallel",)),
    )(x, lp["w1"], lp["b1"].reshape(1, FFN), lp["w2"], lp["b2"].reshape(1, D),
      lp["out_ln_g"].reshape(1, D), lp["out_ln_b"].reshape(1, D))


def _cls_adapter_classifier_kernel(cls_ref, wd_ref, bd_ref, wu_ref, bu_ref,
                                   g_ref, b_ref, wc_ref, bc_ref, o_ref, *, eps):
    """Last-layer adapter (down/ReLU/up/residual/LN) + classifier, CLS rows only."""
    h_bf = cls_ref[...]                                          # (btot, H) bf16
    h = h_bf.astype(jnp.float32)
    down = jnp.dot(h_bf, wd_ref[...],
                   preferred_element_type=jnp.float32) + bd_ref[...]
    down = jnp.maximum(down, 0.0)                                # ReLU
    up = jnp.dot(down.astype(jnp.bfloat16), wu_ref[...],
                 preferred_element_type=jnp.float32) + bu_ref[...]
    adapted = _layernorm(h + up, g_ref[...], b_ref[...], eps)    # dropout = identity (eval)
    o_ref[...] = jnp.dot(adapted.astype(jnp.bfloat16), wc_ref[...],
                         preferred_element_type=jnp.float32) + bc_ref[...]


def cls_adapter_classifier(cls, ap, wc, bc):
    Bt, D = cls.shape
    A = ADAPTER_DIM
    # Tiny kernel over just (btot, H) CLS rows -> grid=(1,) is fine here.
    return pl.pallas_call(
        functools.partial(_cls_adapter_classifier_kernel, eps=ADAPTER_EPS),
        grid=(1,),
        in_specs=[
            pl.BlockSpec((Bt, D), lambda i: (0, 0)),
            pl.BlockSpec((D, A), lambda i: (0, 0)),
            pl.BlockSpec((1, A), lambda i: (0, 0)),
            pl.BlockSpec((A, D), lambda i: (0, 0)),
            pl.BlockSpec((1, D), lambda i: (0, 0)),
            pl.BlockSpec((1, D), lambda i: (0, 0)),
            pl.BlockSpec((1, D), lambda i: (0, 0)),
            pl.BlockSpec((D, 1), lambda i: (0, 0)),
            pl.BlockSpec((1, 1), lambda i: (0, 0)),
        ],
        out_specs=pl.BlockSpec((Bt, 1), lambda i: (0, 0)),
        out_shape=jax.ShapeDtypeStruct((Bt, 1), jnp.float32),
        compiler_params=pltpu.CompilerParams(dimension_semantics=("arbitrary",)),
    )(cls, ap["wd"], ap["bd"].reshape(1, A), ap["wu"], ap["bu"].reshape(1, D),
      ap["g"].reshape(1, D), ap["b"].reshape(1, D), wc, bc.reshape(1, 1))


# ----------------------------------------------------------------------------
# Parameter init (deterministic, synthetic — no checkpoint load)
# ----------------------------------------------------------------------------
def init_params(key):
    keys = iter(jax.random.split(key, 64))

    def w(shape, scale=0.02):
        return (scale * jax.random.normal(next(keys), shape)).astype(jnp.float32)

    zeros = lambda shape: jnp.zeros(shape, jnp.float32)
    ones = lambda shape: jnp.ones(shape, jnp.float32)

    params = {
        "word_emb": w((VOCAB, H)),
        "pos_emb": w((SEQ, H)),
        "type_emb": w((2, H)),
        "emb_ln_g": ones((H,)), "emb_ln_b": zeros((H,)),
        "cls_w": w((H, 1)).astype(jnp.bfloat16), "cls_b": zeros((1,)),
        "layers": [], "adapters": [],
    }
    softmax_scale = 1.0 / (HEAD_DIM ** 0.5)
    for _ in range(N_LAYERS):
        # Fused Q|K|V weight; 1/sqrt(head_dim) folded into the Q columns (free at runtime).
        wqkv = w((H, 3 * H))
        wqkv = wqkv.at[:, :H].multiply(softmax_scale)
        params["layers"].append(dict(
            wqkv=wqkv.astype(jnp.bfloat16), bqkv=zeros((3 * H,)),
            wo=w((H, H)).astype(jnp.bfloat16), bo=zeros((H,)),
            attn_ln_g=ones((H,)), attn_ln_b=zeros((H,)),
            w1=w((H, FFN)).astype(jnp.bfloat16), b1=zeros((FFN,)),
            w2=w((FFN, H)).astype(jnp.bfloat16), b2=zeros((H,)),
            out_ln_g=ones((H,)), out_ln_b=zeros((H,)),
        ))
        params["adapters"].append(dict(
            wd=w((H, ADAPTER_DIM)).astype(jnp.bfloat16), bd=zeros((ADAPTER_DIM,)),
            wu=w((ADAPTER_DIM, H)).astype(jnp.bfloat16), bu=zeros((H,)),
            g=ones((H,)), b=zeros((H,)),
        ))
    return params


# ----------------------------------------------------------------------------
# Forward pass (mirrors BertWithAdapters.forward, frozen BERT + adapters, eval mode)
# ----------------------------------------------------------------------------
def bert_with_adapters_forward(params, input_ids, attention_mask):
    """input_ids / attention_mask: (NUM_CHOICES, B, S). Returns (B, NUM_CHOICES)."""
    C, B, S = input_ids.shape
    btot = C * B                                   # fold choices into batch: 1 BERT pass
    ids = input_ids.reshape(btot, S)
    mask = attention_mask.reshape(btot, S).astype(jnp.float32)
    M = btot * S

    # embeddings; token_type_ids == 0
    # TODO(synk): fuse the gather into the LN kernel via PrefetchScalarGridSpec + pl.Element
    # row gather at real vocab sizes; kept as plain-JAX glue here.
    word = jnp.take(params["word_emb"], ids, axis=0)             # (btot, S, H)
    pos = params["pos_emb"][None, :S, :]
    typ = params["type_emb"][0][None, None, :]
    emb = (word + pos + typ).reshape(M, H)
    x = layernorm_bf16(emb, params["emb_ln_g"], params["emb_ln_b"], BERT_EPS)
    # TODO(synk): BERT dropout layers omitted (eval-mode identity).

    # HF extended attention mask value; shaped (btot, 1, S) for tiled BlockSpecs.
    mask_bias = ((1.0 - mask) * -10000.0).reshape(btot, 1, S)

    for lp in params["layers"]:
        x = attn_block(x, lp, mask_bias, btot, S)                # attn + proj + residual LN
        x = ffn_block(x, lp)                                     # FFN + residual LN
    # Adapters rewrite hidden_states[i+1] post-hoc (the un-adapted state feeds the next layer),
    # and only hidden_states[-1][:, 0] reaches the classifier -> adapters 0..N-2 are dead work.

    cls = x.reshape(btot, S, H)[:, 0, :]                         # (btot, H) bf16 CLS rows
    logit = cls_adapter_classifier(cls, params["adapters"][-1],
                                   params["cls_w"], params["cls_b"])   # (btot, 1)
    return logit.reshape(C, B).transpose(1, 0)                   # (B, NUM_CHOICES)


if __name__ == "__main__":
    key = jax.random.PRNGKey(0)
    pkey, ikey = jax.random.split(key)
    params = init_params(pkey)
    input_ids = jax.random.randint(
        ikey, (NUM_CHOICES, BATCH, SEQ), 0, VOCAB, dtype=jnp.int32)
    attention_mask = jnp.ones((NUM_CHOICES, BATCH, SEQ), jnp.int32)

    logits = bert_with_adapters_forward(params, input_ids, attention_mask)
    logits = jax.block_until_ready(logits)
    assert logits.shape == (BATCH, NUM_CHOICES)
    assert bool(jnp.all(jnp.isfinite(logits)))
    print("KERNEL_OK")
</pallas_src>

<mosaic_0001>
module attributes {stable_mosaic.version = 11 : i64} {
  func.func @_ln_kernel(%arg0: i32, %arg1: memref<32x32xf32, #tpu.memory_space<vmem>>, %arg2: memref<1x32xf32, #tpu.memory_space<vmem>>, %arg3: memref<1x32xf32, #tpu.memory_space<vmem>>, %arg4: memref<32x32xbf16, #tpu.memory_space<vmem>>) attributes {dimension_semantics = [#tpu.dimension_semantics<parallel>], iteration_bounds = array<i64: 2>, scalar_prefetch = 0 : i64, scratch_operands = 0 : i64, tpu.core_type = #tpu.core_type<tc>, window_params = [{transform_indices = @transform_0, window_bounds = array<i64: 32, 32>}, {pipeline_mode = #tpu.pipeline_mode<synchronous>, transform_indices = @transform_1, window_bounds = array<i64: 1, 32>}, {pipeline_mode = #tpu.pipeline_mode<synchronous>, transform_indices = @transform_2, window_bounds = array<i64: 1, 32>}, {transform_indices = @transform_3, window_bounds = array<i64: 32, 32>}]} {
    %c0 = arith.constant 0 : index
    %c0_0 = arith.constant 0 : index
    %0 = vector.load %arg1[%c0, %c0_0] : memref<32x32xf32, #tpu.memory_space<vmem>>, vector<32x32xf32>
    %c0_1 = arith.constant 0 : index
    %c0_2 = arith.constant 0 : index
    %1 = vector.load %arg2[%c0_1, %c0_2] : memref<1x32xf32, #tpu.memory_space<vmem>>, vector<1x32xf32>
    %c0_3 = arith.constant 0 : index
    %c0_4 = arith.constant 0 : index
    %2 = vector.load %arg3[%c0_3, %c0_4] : memref<1x32xf32, #tpu.memory_space<vmem>>, vector<1x32xf32>
    %cst = arith.constant dense<0.000000e+00> : vector<32xf32>
    %3 = vector.multi_reduction <add>, %0, %cst [1] : vector<32x32xf32> to vector<32xf32>
    %4 = vector.shape_cast %3 : vector<32xf32> to vector<32x1xf32>
    %cst_5 = arith.constant 3.200000e+01 : f32
    %5 = vector.broadcast %cst_5 : f32 to vector<32x1xf32>
    %6 = arith.divf %4, %5 : vector<32x1xf32>
    %7 = vector.broadcast %6 : vector<32x1xf32> to vector<32x32xf32>
    %8 = arith.subf %0, %7 : vector<32x32xf32>
    %9 = arith.mulf %8, %8 : vector<32x32xf32>
    %cst_6 = arith.constant dense<0.000000e+00> : vector<32xf32>
    %10 = vector.multi_reduction <add>, %9, %cst_6 [1] : vector<32x32xf32> to vector<32xf32>
    %11 = vector.shape_cast %10 : vector<32xf32> to vector<32x1xf32>
    %cst_7 = arith.constant 3.200000e+01 : f32
    %12 = vector.broadcast %cst_7 : f32 to vector<32x1xf32>
    %13 = arith.divf %11, %12 : vector<32x1xf32>
    %cst_8 = arith.constant 9.99999996E-13 : f32
    %14 = vector.broadcast %cst_8 : f32 to vector<32x1xf32>
    %15 = arith.addf %13, %14 : vector<32x1xf32>
    %16 = math.rsqrt %15 : vector<32x1xf32>
    %17 = vector.broadcast %16 : vector<32x1xf32> to vector<32x32xf32>
    %18 = arith.mulf %8, %17 : vector<32x32xf32>
    %19 = vector.broadcast %1 : vector<1x32xf32> to vector<32x32xf32>
    %20 = arith.mulf %18, %19 : vector<32x32xf32>
    %21 = vector.broadcast %2 : vector<1x32xf32> to vector<32x32xf32>
    %22 = arith.addf %20, %21 : vector<32x32xf32>
    %23 = arith.truncf %22 : vector<32x32xf32> to vector<32x32xbf16>
    %c0_9 = arith.constant 0 : index
    %c0_10 = arith.constant 0 : index
    %24 = vector.load %arg4[%c0_9, %c0_10] : memref<32x32xbf16, #tpu.memory_space<vmem>>, vector<32x32xbf16>
    tpu.vector_store %arg4[%c0_9, %c0_10], %23 {strides = array<i32>} : memref<32x32xbf16, #tpu.memory_space<vmem>>, vector<32x32xbf16>,
    return
  }
  func.func @transform_0(%arg0: i32) -> (i32, i32) {
    %c0_i32 = arith.constant 0 : i32
    %c0_i32_0 = arith.constant 0 : i32
    return %arg0, %c0_i32 : i32, i32
  }
  func.func @transform_1(%arg0: i32) -> (i32, i32) {
    %c0_i32 = arith.constant 0 : i32
    %c0_i32_0 = arith.constant 0 : i32
    %c0_i32_1 = arith.constant 0 : i32
    return %c0_i32, %c0_i32_0 : i32, i32
  }
  func.func @transform_2(%arg0: i32) -> (i32, i32) {
    %c0_i32 = arith.constant 0 : i32
    %c0_i32_0 = arith.constant 0 : i32
    %c0_i32_1 = arith.constant 0 : i32
    return %c0_i32, %c0_i32_0 : i32, i32
  }
  func.func @transform_3(%arg0: i32) -> (i32, i32) {
    %c0_i32 = arith.constant 0 : i32
    %c0_i32_0 = arith.constant 0 : i32
    return %arg0, %c0_i32 : i32, i32
  }
}

</mosaic_0001>

<bundles_post_ra>
// kernel: tpu_custom_call.1
= control target key start
LH: loop header
LB: loop body
LE: loop exit
PB: predicated region body
PF: predicated region fallthrough
CT: control target
= control target key end

     0   :  { %s396_s12 = smov 0   ;;  %s435_s0 = inlined_call_operand.vmem [shape: f32[64,32], index: 0, kind: input, shape index: {}]   ;;  %s436_s1 = inlined_call_operand.vmem [shape: f32[1,32], index: 1, kind: input, shape index: {}]   ;;  %s437_s2 = inlined_call_operand.vmem [shape: f32[1,32], index: 2, kind: input, shape index: {}]   ;;  %s438_s3 = inlined_call_operand.vmem [shape: bf16[64,32], index: 3, kind: output, shape index: {}]  }
   0x1 LB: > { %s331_s13 = sadd.s32 4294967295, %s374_s12   ;;  %p335_p0 = scmp.ge.s32.totalorder %s374_s12, 1  ;;  %s374_s12 = sphi %s396_s12, %s13_s12  }
   0x2   : > { %p138_p1 = scmp.lt.s32.totalorder %s374_s12, 3 }
   0x4   : > { %p139_p2 = pnand %p335_p0, %p138_p1 }
   0x5   : > { %s336_s14 = sshll.u32 (!%p139_p2), %s331_s13, 2  ;;  %vm180_vm0 = vcmask (!%p139_p2), 261120   ;;  %v340_v41 = vld [vmem:[%s436_s1] ss:$0 sm:$0xff] (!%p139_p2)  ;;  %vm270_vm1 = vcmask (!%p139_p2), 257024  }
   0x6   : > { %142 = sbr.rel (%p139_p2) target bundleno = 341 (0x155), region = 32  ;;  %p163_p3 = scmp.lt.s32.totalorder (!%p139_p2), %s336_s14, 7  ;;  %v341_v43 = vld [vmem:[%s437_s2] ss:$0 sm:$0xff] (!%p139_p2) }
   0xd   : > { %s440_s14 = smov (!%p163_p3, %s336_s14), 7 }
   0xe   : > { %s337_s15 = sshll.u32 %s440_s14, 3  ;;  %s339_s23 = sshll.u32 %s440_s14, 2 }
   0xf   : > { %s166_s18 = scalar_lea.vmem %s435_s0, %s337_s15  ;;  %s172_s26 = scalar_lea.vmem %s438_s3, %s339_s23 }
  0x10   : > { %v174_v0 = vld [vmem:[%s166_s18] sm:$0xff]  ;;  %v176_v1 = vld [vmem:[%s166_s18 + $0x10] sm:$0xff]  ;;  %v175_v2 = vld [vmem:[%s166_s18 + $0x8] sm:$0xff] }
  0x11   : > { %v181_v3 = vsel %vm180_vm0, %v174_v0, 0.0  ;;  %v187_v4 = vsel %vm180_vm0, %v176_v1, 0.0  ;;  %v177_v5 = vld [vmem:[%s166_s18 + $0x18] sm:$0xff]  ;;  %v184_v6 = vsel %vm180_vm0, %v175_v2, 0.0 }
  0x12   : > { %182 = vadd.xlane.f32.xlu0 %v181_v3  ;;  %188 = vadd.xlane.f32.xlu1 %v187_v4  ;;  %v190_v7 = vsel %vm180_vm0, %v177_v5, 0.0 }
  0x16   : > { %185 = vadd.xlane.f32.xlu0 %v184_v6  ;;  %191 = vadd.xlane.f32.xlu1 %v190_v7 }
  0x9f   : > { %v183_v8 = vpop.xlane.xlu0 %182  ;;  %v189_v9 = vpop.xlane.xlu1 %188 }
  0xa0   : > { %v194_v10 = vmul.f32 0.03125, %v183_v8  ;;  %v196_v11 = vmul.f32 0.03125, %v189_v9 }
  0xa2   : > { %v198_v12 = vsub.f32 %v174_v0, %v194_v10  ;;  %v200_v13 = vsub.f32 %v176_v1, %v196_v11 }
  0xa3   : > { %v186_v14 = vpop.xlane.xlu0 %185  ;;  %v192_v15 = vpop.xlane.xlu1 %191 }
  0xa4   : > { %v195_v16 = vmul.f32 0.03125, %v186_v14  ;;  %v197_v17 = vmul.f32 0.03125, %v192_v15  ;;  %v202_v18 = vmul.f32 %v198_v12, %v198_v12  ;;  %v204_v19 = vmul.f32 %v200_v13, %v200_v13 }
  0xa6   : > { %v199_v20 = vsub.f32 %v175_v2, %v195_v16  ;;  %v201_v21 = vsub.f32 %v177_v5, %v197_v17  ;;  %v206_v22 = vsel %vm180_vm0, %v202_v18, 0.0  ;;  %v212_v23 = vsel %vm180_vm0, %v204_v19, 0.0 }
  0xa7   : > { %207 = vadd.xlane.f32.xlu0 %v206_v22 }
  0xa8   : > { %v203_v24 = vmul.f32 %v199_v20, %v199_v20  ;;  %v205_v25 = vmul.f32 %v201_v21, %v201_v21 }
  0xaa   : > { %v209_v26 = vsel %vm180_vm0, %v203_v24, 0.0  ;;  %v215_v27 = vsel %vm180_vm0, %v205_v25, 0.0 }
  0xab   : > { %213 = vadd.xlane.f32.xlu0 %v212_v23  ;;  %210 = vadd.xlane.f32.xlu1 %v209_v26 }
  0xaf   : > { %216 = vadd.xlane.f32.xlu1 %v215_v27 }
 0x134   : > { %v208_v28 = vpop.xlane.xlu0 %207 }
 0x135   : > { %v218_v29 = vmul.f32 0.03125, %v208_v28 }
 0x137   : > { %v222_v30 = vadd.f32 1e-12, %v218_v29 }
 0x138   : > { %v211_v31 = vpop.xlane.xlu1 %210  ;;  %v214_v32 = vpop.xlane.xlu0 %213 }
 0x139   : > { %360 = vrsqrt.f32 %v222_v30  ;;  %v219_v33 = vmul.f32 0.03125, %v211_v31  ;;  %v220_v34 = vmul.f32 0.03125, %v214_v32 }
 0x13b   : > { %v223_v35 = vadd.f32 1e-12, %v219_v33  ;;  %v224_v36 = vadd.f32 1e-12, %v220_v34 }
 0x13c   : > { %v217_v37 = vpop.xlane.xlu1 %216 }
 0x13d   : > { %362 = vrsqrt.f32 %v223_v35  ;;  %v221_v38 = vmul.f32 0.03125, %v217_v37 }
 0x13e   : > { %364 = vrsqrt.f32 %v224_v36 }
 0x13f   : > { %v225_v39 = vadd.f32 1e-12, %v221_v38 }
 0x141   : > { %366 = vrsqrt.f32 %v225_v39 }
 0x143   : > { %v361_v40 = vpop.eup %360 }
 0x144   : > { %v230_v42 = vmul.f32 %v361_v40, %v198_v12 }
 0x146   : > { %v240_v44 = vmul.f32 %v340_v41, %v230_v42 }
 0x147   : > { %v363_v45 = vpop.eup %362 }
 0x148   : > { %v365_v46 = vpop.eup %364  ;;  %v250_v47 = vadd.f32 %v341_v43, %v240_v44  ;;  %v231_v48 = vmul.f32 %v363_v45, %v199_v20 }
 0x149   : > { %v232_v49 = vmul.f32 %v365_v46, %v200_v13 }
 0x14a   : > { %v348_v50 = vpack.c.bf16 %v250_v47, %v250_v47  ;;  %v241_v51 = vmul.f32 %v340_v41, %v231_v48 }
 0x14b   : > { %v367_v52 = vpop.eup %366  ;;  %v242_v53 = vmul.f32 %v340_v41, %v232_v49 }
 0x14c   : > { %271 = vst.msk [vmem:[%s172_s26] sm:$0xf] %vm270_vm1, %v348_v50  ;;  %v251_v54 = vadd.f32 %v341_v43, %v241_v51  ;;  %v233_v55 = vmul.f32 %v367_v52, %v201_v21 }
 0x14d   : > { %v252_v56 = vadd.f32 %v341_v43, %v242_v53 }
 0x14e   : > { %v349_v57 = vpack.c.bf16 %v251_v54, %v251_v54  ;;  %v243_v58 = vmul.f32 %v340_v41, %v233_v55 }
 0x14f   : > { %v350_v59 = vpack.c.bf16 %v252_v56, %v252_v56 }
 0x150   : > { %272 = vst.msk [vmem:[%s172_s26 + $0x4] sm:$0xf] %vm270_vm1, %v349_v57  ;;  %v253_v60 = vadd.f32 %v341_v43, %v243_v58 }
 0x151   : > { %273 = vst.msk [vmem:[%s172_s26 + $0x8] sm:$0xf] %vm270_vm1, %v350_v59 }
 0x152   : > { %v351_v61 = vpack.c.bf16 %v253_v60, %v253_v60 }
 0x154   : > { %274 = vst.msk [vmem:[%s172_s26 + $0xc] sm:$0xf] %vm270_vm1, %v351_v61 }
 0x155 PF: > { %s13_s12 = sadd.s32 1, %s374_s12  }
 0x156   : > { %p10_p4 = scmp.ge.s32.totalorder %s13_s12, 4  }
 0x158   :  { %12 = sbr.rel (!%p10_p4) target bundleno = 1 (0x1), region = 62 }

</bundles_post_ra>
